<compile_context>
chip_gen: v5e
topology: v5e:2x2
jax: 0.10.0
libtpu: 0.0.40
codegen_flags: <defaults>
</compile_context>

<pallas_src>
import functools

import jax
import jax.numpy as jnp
from jax.experimental import pallas as pl
from jax.experimental.pallas import tpu as pltpu

LANES = 128
MAX_TILE_ROWS = 8192            # (8192, 128) f32 = 4 MiB per operand block
ACC_ROWS = 128                  # (128, 128) f32 accumulator = 16 vregs / core
NUM_CORES = 2                   # outer "parallel" grid axis (both TCs on v7x)
VMEM_LIMIT_BYTES = 48 * 1024 * 1024   # explicit budget; safe on v5e/v6e/v7x


def _round_up(a, b):
    return (a + b - 1) // b * b


def _charbonnier_partial_kernel(x_ref, y_ref, out_ref, *, eps, n_rows,
                                tile_rows, tiles_per_core, acc_rows):
    """Accumulate per-lane partial sums of sqrt((x-y)^2 + eps) into (acc_rows, 128)."""
    c = pl.program_id(0)          # core split ("parallel")
    i = pl.program_id(1)          # reduction axis ("arbitrary"), output resident

    @pl.when(i == 0)
    def _():
        out_ref[...] = jnp.zeros_like(out_ref)

    t = c * tiles_per_core + i    # unclamped global tile index
    n_full = n_rows // tile_rows  # static: number of fully-valid tiles

    d = x_ref[...].astype(jnp.float32) - y_ref[...].astype(jnp.float32)
    val = jnp.sqrt(d * d + eps)
    folds = tile_rows // acc_rows

    # Fast path: interior tiles need no masking (the common case).
    @pl.when(t < n_full)
    def _():
        out_ref[...] += jnp.sum(val.reshape(folds, acc_rows, LANES), axis=0)

    # Slow path: at most one partial tile per call, plus any clamped duplicate
    # tile on a core with no remaining work -- mask rows past n_rows to zero.
    @pl.when(t >= n_full)
    def _():
        row0 = t * tile_rows
        rows = jax.lax.broadcasted_iota(jnp.int32, (tile_rows, LANES), 0) + row0
        masked = jnp.where(rows < n_rows, val, 0.0)
        out_ref[...] += jnp.sum(masked.reshape(folds, acc_rows, LANES), axis=0)


def charbonnier_loss(x, y, eps=1e-9):
    """Pallas TPU implementation of CharbonnierLoss.forward(x, y)."""
    assert x.shape == y.shape, "x and y must have the same shape"
    eps = float(eps)              # static Python constant (no captured tracer)
    n_elems = int(x.size)
    if n_elems == 0:
        return jnp.zeros((), x.dtype)

    flat_x = jnp.ravel(x)
    flat_y = jnp.ravel(y)

    n_rows = n_elems // LANES     # full 128-wide rows
    main_elems = n_rows * LANES
    rem = n_elems - main_elems    # < 128 leftover elements

    total = jnp.float32(0.0)

    if n_rows > 0:
        if rem > 0:
            # TODO(synk): for sizes that are not a multiple of 128 this prefix
            # slice may materialize a near-full copy of x/y before the kernel;
            # multiple-of-128 sizes take the zero-copy reshape path below.
            xs = jax.lax.slice(flat_x, (0,), (main_elems,))
            ys = jax.lax.slice(flat_y, (0,), (main_elems,))
        else:
            xs, ys = flat_x, flat_y
        xs = xs.reshape(n_rows, LANES)
        ys = ys.reshape(n_rows, LANES)

        # Round the tile to a multiple of 128 rows: satisfies the sublane
        # min-tile for f32/bf16/int8 inputs and lets the accumulator be
        # (128, 128) with a short, parallel fold.  Over-read (<128 rows) of the
        # last partial tile is masked in-kernel.
        tile_rows = min(MAX_TILE_ROWS, _round_up(n_rows, ACC_ROWS))
        acc_rows = ACC_ROWS

        tiles_total = pl.cdiv(n_rows, tile_rows)
        num_cores = min(NUM_CORES, tiles_total)   # no duplicate block for tiny inputs
        tiles_per_core = pl.cdiv(tiles_total, num_cores)

        def in_map(c, i):
            # Clamp so a core with no remaining work re-reads the last block;
            # its contribution is fully masked to zero in the kernel.
            return (jnp.minimum(c * tiles_per_core + i, tiles_total - 1), 0)

        kernel = functools.partial(
            _charbonnier_partial_kernel,
            eps=eps, n_rows=n_rows, tile_rows=tile_rows,
            tiles_per_core=tiles_per_core, acc_rows=acc_rows)

        partials = pl.pallas_call(
            kernel,
            out_shape=jax.ShapeDtypeStruct((num_cores, acc_rows, LANES),
                                           jnp.float32),
            grid_spec=pltpu.PrefetchScalarGridSpec(
                num_scalar_prefetch=0,
                grid=(num_cores, tiles_per_core),
                in_specs=[
                    pl.BlockSpec((tile_rows, LANES), in_map),
                    pl.BlockSpec((tile_rows, LANES), in_map),
                ],
                out_specs=pl.BlockSpec((None, acc_rows, LANES),
                                       lambda c, i: (c, 0, 0)),
            ),
            compiler_params=pltpu.CompilerParams(
                dimension_semantics=("parallel", "arbitrary"),
                vmem_limit_bytes=VMEM_LIMIT_BYTES),
        )(xs, ys)

        total = total + jnp.sum(partials)

    if rem > 0:
        # Tiny (<128 element) tail handled in plain jnp -- avoids padding copies.
        dt = (flat_x[main_elems:].astype(jnp.float32)
              - flat_y[main_elems:].astype(jnp.float32))
        total = total + jnp.sum(jnp.sqrt(dt * dt + eps))

    loss = total / jnp.float32(n_elems)
    return loss.astype(x.dtype)


if __name__ == "__main__":
    key = jax.random.PRNGKey(0)
    kx, ky = jax.random.split(key)
    # Shapes consistent with a typical NCHW input to CharbonnierLoss.
    x = jax.random.normal(kx, (2, 4, 16, 16), dtype=jnp.float32)
    y = jax.random.normal(ky, (2, 4, 16, 16), dtype=jnp.float32)

    loss = charbonnier_loss(x, y, eps=1e-9)
    jax.block_until_ready(loss)

    # Reference check (plain JAX, same math as the PyTorch module).
    ref = jnp.mean(jnp.sqrt((x - y) * (x - y) + 1e-9))
    assert jnp.allclose(loss, ref, rtol=1e-5, atol=1e-6), (loss, ref)

    print("KERNEL_OK")
</pallas_src>

<mosaic_0001>
module attributes {stable_mosaic.version = 11 : i64} {
  func.func @_charbonnier_partial_kernel(%arg0: i32, %arg1: i32, %arg2: memref<128x128xf32, #tpu.memory_space<vmem>>, %arg3: memref<128x128xf32, #tpu.memory_space<vmem>>, %arg4: memref<1x128x128xf32, #tpu.memory_space<vmem>>) attributes {dimension_semantics = [#tpu.dimension_semantics<parallel>, #tpu.dimension_semantics<arbitrary>], iteration_bounds = array<i64: 1, 1>, scalar_prefetch = 0 : i64, scratch_operands = 0 : i64, tpu.core_type = #tpu.core_type<tc>, window_params = [{transform_indices = @transform_0, window_bounds = array<i64: 128, 128>}, {transform_indices = @transform_1, window_bounds = array<i64: 128, 128>}, {transform_indices = @transform_2, window_bounds = array<i64: 1, 128, 128>}]} {
    %c0_i32 = arith.constant 0 : i32
    %0 = arith.cmpi eq, %arg1, %c0_i32 : i32
    %1 = arith.extui %0 : i1 to i32
    %c0_i32_0 = arith.constant 0 : i32
    %2 = arith.cmpi ne, %1, %c0_i32_0 : i32
    scf.if %2 {
      %cst_8 = arith.constant 0.000000e+00 : f32
      %18 = vector.broadcast %cst_8 : f32 to vector<128x128xf32>
      %c0_9 = arith.constant 0 : index
      %c0_10 = arith.constant 0 : index
      %c0_11 = arith.constant 0 : index
      %19 = vector.load %arg4[%c0_9, %c0_10, %c0_11] : memref<1x128x128xf32, #tpu.memory_space<vmem>>, vector<1x128x128xf32>
      %20 = vector.shape_cast %19 : vector<1x128x128xf32> to vector<128x128xf32>
      %21 = vector.shape_cast %18 : vector<128x128xf32> to vector<1x128x128xf32>
      tpu.vector_store %arg4[%c0_9, %c0_10, %c0_11], %21 {strides = array<i32>} : memref<1x128x128xf32, #tpu.memory_space<vmem>>, vector<1x128x128xf32>,
    } else {
    }
    %c1_i32 = arith.constant 1 : i32
    %3 = arith.muli %arg0, %c1_i32 : i32
    %4 = arith.addi %3, %arg1 : i32
    %c0 = arith.constant 0 : index
    %c0_1 = arith.constant 0 : index
    %5 = vector.load %arg2[%c0, %c0_1] : memref<128x128xf32, #tpu.memory_space<vmem>>, vector<128x128xf32>
    %c0_2 = arith.constant 0 : index
    %c0_3 = arith.constant 0 : index
    %6 = vector.load %arg3[%c0_2, %c0_3] : memref<128x128xf32, #tpu.memory_space<vmem>>, vector<128x128xf32>
    %7 = arith.subf %5, %6 : vector<128x128xf32>
    %8 = arith.mulf %7, %7 : vector<128x128xf32>
    %cst = arith.constant 9.99999971E-10 : f32
    %9 = vector.broadcast %cst : f32 to vector<128x128xf32>
    %10 = arith.addf %8, %9 : vector<128x128xf32>
    %11 = math.sqrt %10 : vector<128x128xf32>
    %c0_i32_4 = arith.constant 0 : i32
    %12 = arith.cmpi slt, %4, %c0_i32_4 : i32
    %13 = arith.extui %12 : i1 to i32
    %c0_i32_5 = arith.constant 0 : i32
    %14 = arith.cmpi ne, %13, %c0_i32_5 : i32
    scf.if %14 {
      %c0_8 = arith.constant 0 : index
      %c0_9 = arith.constant 0 : index
      %c0_10 = arith.constant 0 : index
      %18 = vector.load %arg4[%c0_8, %c0_9, %c0_10] : memref<1x128x128xf32, #tpu.memory_space<vmem>>, vector<1x128x128xf32>
      %19 = vector.shape_cast %18 : vector<1x128x128xf32> to vector<128x128xf32>
      %20 = vector.shape_cast %11 : vector<128x128xf32> to vector<1x128x128xf32>
      %cst_11 = arith.constant dense<0.000000e+00> : vector<128x128xf32>
      %21 = vector.multi_reduction <add>, %20, %cst_11 [0] : vector<1x128x128xf32> to vector<128x128xf32>
      %22 = arith.addf %19, %21 : vector<128x128xf32>
      %c0_12 = arith.constant 0 : index
      %c0_13 = arith.constant 0 : index
      %c0_14 = arith.constant 0 : index
      %23 = vector.load %arg4[%c0_12, %c0_13, %c0_14] : memref<1x128x128xf32, #tpu.memory_space<vmem>>, vector<1x128x128xf32>
      %24 = vector.shape_cast %23 : vector<1x128x128xf32> to vector<128x128xf32>
      %25 = vector.shape_cast %22 : vector<128x128xf32> to vector<1x128x128xf32>
      tpu.vector_store %arg4[%c0_12, %c0_13, %c0_14], %25 {strides = array<i32>} : memref<1x128x128xf32, #tpu.memory_space<vmem>>, vector<1x128x128xf32>,
    } else {
    }
    %c0_i32_6 = arith.constant 0 : i32
    %15 = arith.cmpi sge, %4, %c0_i32_6 : i32
    %16 = arith.extui %15 : i1 to i32
    %c0_i32_7 = arith.constant 0 : i32
    %17 = arith.cmpi ne, %16, %c0_i32_7 : i32
    scf.if %17 {
      %c128_i32 = arith.constant 128 : i32
      %18 = arith.muli %4, %c128_i32 : i32
      %19 = tpu.iota {dimensions = array<i32: 0>} : vector<128x128xi32>
      %20 = vector.broadcast %18 : i32 to vector<128x128xi32>
      %21 = arith.addi %19, %20 : vector<128x128xi32>
      %c16_i32 = arith.constant 16 : i32
      %22 = vector.broadcast %c16_i32 : i32 to vector<128x128xi32>
      %23 = arith.cmpi slt, %21, %22 : vector<128x128xi32>
      %cst_8 = arith.constant 0.000000e+00 : f32
      %24 = vector.broadcast %cst_8 : f32 to vector<128x128xf32>
      %25 = arith.select %23, %11, %24 : vector<128x128xi1>, vector<128x128xf32>
      %c0_9 = arith.constant 0 : index
      %c0_10 = arith.constant 0 : index
      %c0_11 = arith.constant 0 : index
      %26 = vector.load %arg4[%c0_9, %c0_10, %c0_11] : memref<1x128x128xf32, #tpu.memory_space<vmem>>, vector<1x128x128xf32>
      %27 = vector.shape_cast %26 : vector<1x128x128xf32> to vector<128x128xf32>
      %28 = vector.shape_cast %25 : vector<128x128xf32> to vector<1x128x128xf32>
      %cst_12 = arith.constant dense<0.000000e+00> : vector<128x128xf32>
      %29 = vector.multi_reduction <add>, %28, %cst_12 [0] : vector<1x128x128xf32> to vector<128x128xf32>
      %30 = arith.addf %27, %29 : vector<128x128xf32>
      %c0_13 = arith.constant 0 : index
      %c0_14 = arith.constant 0 : index
      %c0_15 = arith.constant 0 : index
      %31 = vector.load %arg4[%c0_13, %c0_14, %c0_15] : memref<1x128x128xf32, #tpu.memory_space<vmem>>, vector<1x128x128xf32>
      %32 = vector.shape_cast %31 : vector<1x128x128xf32> to vector<128x128xf32>
      %33 = vector.shape_cast %30 : vector<128x128xf32> to vector<1x128x128xf32>
      tpu.vector_store %arg4[%c0_13, %c0_14, %c0_15], %33 {strides = array<i32>} : memref<1x128x128xf32, #tpu.memory_space<vmem>>, vector<1x128x128xf32>,
    } else {
    }
    return
  }
  func.func @transform_0(%arg0: i32, %arg1: i32) -> (i32, i32) {
    %c1_i32 = arith.constant 1 : i32
    %0 = arith.muli %arg0, %c1_i32 : i32
    %1 = arith.addi %0, %arg1 : i32
    %c0_i32 = arith.constant 0 : i32
    %2 = arith.minsi %1, %c0_i32 : i32
    %c0_i32_0 = arith.constant 0 : i32
    %c0_i32_1 = arith.constant 0 : i32
    return %2, %c0_i32_0 : i32, i32
  }
  func.func @transform_1(%arg0: i32, %arg1: i32) -> (i32, i32) {
    %c1_i32 = arith.constant 1 : i32
    %0 = arith.muli %arg0, %c1_i32 : i32
    %1 = arith.addi %0, %arg1 : i32
    %c0_i32 = arith.constant 0 : i32
    %2 = arith.minsi %1, %c0_i32 : i32
    %c0_i32_0 = arith.constant 0 : i32
    %c0_i32_1 = arith.constant 0 : i32
    return %2, %c0_i32_0 : i32, i32
  }
  func.func @transform_2(%arg0: i32, %arg1: i32) -> (i32, i32, i32) {
    %c0_i32 = arith.constant 0 : i32
    %c0_i32_0 = arith.constant 0 : i32
    %c0_i32_1 = arith.constant 0 : i32
    return %arg0, %c0_i32, %c0_i32_0 : i32, i32, i32
  }
}

</mosaic_0001>

<bundles_post_ra>
// kernel: tpu_custom_call.1
= control target key start
LH: loop header
LB: loop body
LE: loop exit
PB: predicated region body
PF: predicated region fallthrough
CT: control target
= control target key end

     0   :  { %7 = vsyncpa [#allocation3], 0  ;;  %s725_s0 = inlined_call_operand.hbm [shape: f32[16,128], index: 0, kind: input, shape index: {}]   ;;  %s726_s1 = inlined_call_operand.hbm [shape: f32[16,128], index: 1, kind: input, shape index: {}]   ;;  %s727_s2 = inlined_call_operand.hbm [shape: f32[1,128,128], index: 2, kind: output, shape index: {}]  }
   0x1   :  { %8 = vsyncpa [#allocation6], 0 }
   0x2   :  { %9 = vsyncpa [#allocation4], 0 }
   0x3   :  { %20 = vsyncadd [#allocation3], 1792  ;;  %s25_s11 = sshll.u32 %s725_s0, 4  ;;  %s686_s12 = smov [#allocation2]   ;;  %s26_s11 = int_to_ptr.hbm [resolvable:$true] %s25_s11 }
   0x4   :  { %s27_s13 = sshll.u32 %s686_s12, 4  ;;  %s687_s14 = smov 128   ;;  %s28_s13 = int_to_ptr.vmem [resolvable:$true] %s27_s13 }
   0x5   :  { %s688_s15 = smov 8  }
   0x6   :  { %33 = dma.hbm_to_vmem [thread:$0]  %s26_s11, 256, %s28_s13, [#allocation3], %s687_s14, %s687_s14, %s688_s15  }
   0x7   :  { %44 = vsyncadd [#allocation6], 1792  ;;  %s49_s18 = sshll.u32 %s726_s1, 4  ;;  %s689_s19 = smov [#allocation5]   ;;  %s50_s18 = int_to_ptr.hbm [resolvable:$true] %s49_s18 }
   0x8   :  { %s51_s20 = sshll.u32 %s689_s19, 4  ;;  %s52_s20 = int_to_ptr.vmem [resolvable:$true] %s51_s20 }
   0x9   :  { %57 = dma.hbm_to_vmem [thread:$0]  %s50_s18, 256, %s52_s20, [#allocation6], %s687_s14, %s687_s14, %s688_s15  }
   0xa   :  { %680 = dma.done.wait [#allocation3], 2048  }
   0xb   :  { %681 = vsyncadd [#allocation3], 4294965248 }
   0xc   :  { %682 = dma.done.wait [#allocation6], 2048  }
   0xd   :  { %683 = vsyncadd [#allocation6], 4294965248  ;;  %v690_v0 = vmov 0.0   ;;  %v99_v1 = vld [vmem:[#allocation2] sm:$0xff]  ;;  %v100_v3 = vld [vmem:[#allocation2 + $0x8] sm:$0xff]  ;;  %s691_s0 = smov [#allocation7]  }
   0xe   :  { %560 = vst [vmem:[#allocation7 + $0x10] sm:$0xff] %v690_v0  ;;  %v115_v2 = vld [vmem:[#allocation5] sm:$0xff]  ;;  %v116_v5 = vld [vmem:[#allocation5 + $0x8] sm:$0xff]  ;;  %s578_s1 = sshll.u32 %s691_s0, 4  ;;  %s580_s23 = sshll.u32 %s727_s2, 4  ;;  %s579_s1 = int_to_ptr.vmem [resolvable:$true] %s578_s1  ;;  %s581_s23 = int_to_ptr.hbm [resolvable:$true] %s580_s23 }
   0xf   :  { %561 = vst [vmem:[#allocation7 + $0x18] sm:$0xff] %v690_v0  ;;  %v131_v4 = vsub.f32 %v99_v1, %v115_v2  ;;  %v132_v6 = vsub.f32 %v100_v3, %v116_v5 }
  0x10   :  { %562 = vst [vmem:[#allocation7 + $0x20] sm:$0xff] %v690_v0 }
  0x11   :  { %563 = vst [vmem:[#allocation7 + $0x28] sm:$0xff] %v690_v0  ;;  %v147_v7 = vmul.f32 %v131_v4, %v131_v4  ;;  %v148_v8 = vmul.f32 %v132_v6, %v132_v6 }
  0x12   :  { %564 = vst [vmem:[#allocation7 + $0x30] sm:$0xff] %v690_v0 }
  0x13   :  { %565 = vst [vmem:[#allocation7 + $0x38] sm:$0xff] %v690_v0  ;;  %v163_v9 = vadd.f32 1e-09, %v147_v7  ;;  %v164_v10 = vadd.f32 1e-09, %v148_v8 }
  0x14   :  { %566 = vst [vmem:[#allocation7 + $0x40] sm:$0xff] %v690_v0 }
  0x15   :  { %567 = vst [vmem:[#allocation7 + $0x48] sm:$0xff] %v690_v0  ;;  %604 = vrsqrt.f32 %v163_v9  ;;  %vm186_vm0 = vcmp.eq.f32.partialorder %v163_v9, inf  ;;  %v189_v22 = vand.u32 2147483648, %v163_v9  ;;  %vm188_vm1 = vcmp.eq.f32.partialorder %v163_v9, 0.0 }
  0x16   :  { %568 = vst [vmem:[#allocation7 + $0x50] sm:$0xff] %v690_v0  ;;  %606 = vrsqrt.f32 %v164_v10  ;;  %vm198_vm2 = vcmp.eq.f32.partialorder %v164_v10, inf  ;;  %v201_v25 = vand.u32 2147483648, %v164_v10  ;;  %vm200_vm3 = vcmp.eq.f32.partialorder %v164_v10, 0.0 }
  0x17   :  { %569 = vst [vmem:[#allocation7 + $0x58] sm:$0xff] %v690_v0 }
  0x18   :  { %570 = vst [vmem:[#allocation7 + $0x60] sm:$0xff] %v690_v0 }
  0x19   :  { %571 = vst [vmem:[#allocation7 + $0x68] sm:$0xff] %v690_v0 }
  0x1a   :  { %572 = vst [vmem:[#allocation7 + $0x70] sm:$0xff] %v690_v0 }
  0x1b   :  { %573 = vst [vmem:[#allocation7 + $0x78] sm:$0xff] %v690_v0  ;;  %v605_v11 = vpop.eup %604 }
  0x1c   :  { %v607_v12 = vpop.eup %606  ;;  %v180_v13 = vmul.f32 %v605_v11, %v163_v9 }
  0x1d   :  { %v192_v14 = vmul.f32 %v607_v12, %v164_v10 }
  0x1e   :  { %v181_v15 = vmul.f32 %v605_v11, %v180_v13 }
  0x1f   :  { %v193_v16 = vmul.f32 %v607_v12, %v192_v14 }
  0x20   :  { %v182_v17 = vmul.f32 0.5, %v181_v15 }
  0x21   :  { %v194_v18 = vmul.f32 0.5, %v193_v16 }
  0x22   :  { %v183_v19 = vsub.f32 1.5, %v182_v17 }
  0x23   :  { %v195_v20 = vsub.f32 1.5, %v194_v18 }
  0x24   :  { %v184_v21 = vmul.f32 %v605_v11, %v183_v19 }
  0x25   :  { %v196_v23 = vmul.f32 %v607_v12, %v195_v20 }
  0x26   :  { %v185_v24 = vmul.f32 %v184_v21, %v163_v9 }
  0x27   :  { %v197_v26 = vmul.f32 %v196_v23, %v164_v10 }
  0x28   :  { %v187_v27 = vsel %vm186_vm0, %v163_v9, %v185_v24 }
  0x29   :  { %v190_v28 = vsel %vm188_vm1, %v189_v22, %v187_v27  ;;  %v199_v29 = vsel %vm198_vm2, %v164_v10, %v197_v26 }
  0x2a   :  { %v202_v30 = vsel %vm200_vm3, %v201_v25, %v199_v29  ;;  %558 = vst [vmem:[#allocation7] sm:$0xff] %v190_v28 }
  0x2b   :  { %559 = vst [vmem:[#allocation7 + $0x8] sm:$0xff] %v202_v30 }
  0x2c   :  { %586 = dma.vmem_to_hbm [thread:$0]  %s579_s1, 2048, %s581_s23, [#allocation4], %s687_s14, %s687_s14, %s688_s15  }
  0x2d   :  { %684 = dma.done.wait [#allocation4], 2048  }
  0x2e   :  { %685 = vsyncadd [#allocation4], 4294965248 }
  0x2f   :  { %591 = vsyncpa [#allocation3], 1 }
  0x30   :  { %592 = vsyncpa [#allocation6], 1 }
  0x31   :  { %593 = vsyncpa [#allocation4], 1 }

</bundles_post_ra>
